<compile_context>
chip_gen: v5e
topology: v5e:2x2
jax: 0.10.0
libtpu: 0.0.40
codegen_flags: <defaults>
</compile_context>

<pallas_src>
import jax
import jax.numpy as jnp
from jax.experimental import pallas as pl
from jax.experimental.pallas import tpu as pltpu


def _round_up(x: int, m: int) -> int:
    return (x + m - 1) // m * m


def _cdiv(a: int, b: int) -> int:
    return (a + b - 1) // b


def _vmem_budget_bytes() -> int:
    """Generation-aware VMEM budget, with headroom for compiler scratch."""
    try:
        cap = int(pltpu.get_tpu_info().vmem_capacity_bytes)
    except Exception:
        cap = 64 << 20  # conservative fallback: v7x per-TensorCore VMEM
    # Use at most 3/4 of physical VMEM: <=48 MiB on v7x, <=96 MiB on v5e/v6e.
    return max(min(cap * 3 // 4, 96 << 20), 16 << 20)


# ----------------------------------------------------------------------------
# Kernels
# ----------------------------------------------------------------------------
def fused_energy_kernel(x_ref, w_ref, c_ref, o_ref):
    # x_ref: (tm, dim_a)  row tile (VMEM)
    # w_ref: (1, dim_a)   fused weight row = W1^T @ W2^T  (grid-invariant)
    # c_ref: (1,)         fused scalar bias  (SMEM)
    # o_ref: (1, tm)      lane-dense energies for this row tile
    # Pure VPU multiply + XLU cross-lane reduce: no MXU, no W1 traffic.
    e = jnp.sum(x_ref[...].astype(jnp.float32) * w_ref[...], axis=-1) + c_ref[0]
    o_ref[...] = e[None, :].astype(o_ref.dtype)


def two_layer_energy_kernel(x_ref, w1_ref, b1_ref, w2_ref, b2_ref, o_ref):
    # Structural (non-fused) variant, mirrors the module layer-by-layer.
    # x_ref : (tm, dim_a)     row tile
    # w1_ref: (dim_a, dim_a)  W1^T   (grid-invariant)
    # b1_ref: (1, dim_a)      bias row (grid-invariant)
    # w2_ref: (1, dim_a)      W2 row   (grid-invariant)
    # b2_ref: (1,)            scalar bias (SMEM)
    h = jnp.dot(x_ref[...], w1_ref[...],
                preferred_element_type=jnp.float32) + b1_ref[...]
    # Layer 2 on the VPU/XLU (avoids a wasteful N=1 MXU matmul).
    e = jnp.sum(h * w2_ref[...], axis=-1) + b2_ref[0]
    o_ref[...] = e[None, :].astype(o_ref.dtype)


# ----------------------------------------------------------------------------
# Wrapper
# ----------------------------------------------------------------------------
def x_to_energy(x_a, w1, b1, w2, b2, *, tm=None, fuse=True):
    """x_a: (batch, nodes, dim_a) -> energy (batch, nodes).

    w1: (dim_a, dim_a)  (PyTorch layout: out x in)   b1: (dim_a,)
    w2: (1, dim_a)                                   b2: (1,)
    fuse=True uses the algebraically identical single affine map (default);
    fuse=False keeps the explicit two-layer structure of the module.
    """
    batch, nodes, dim_a = x_a.shape
    M = batch * nodes
    dtype = x_a.dtype

    # --- tile selection (VMEM-aware, lane-padded footprints) -----------------
    lane_a = _round_up(max(dim_a, 128), 128)           # minor dim as stored in VMEM
    budget = _vmem_budget_bytes()
    # Per-row f32 bytes: x tile double-buffered + one live intermediate copy
    # (+ h for the two-layer path) + (8, tm) output slab double-buffered.
    per_row = (3 + (0 if fuse else 1)) * lane_a * 4 + 2 * 8 * 4
    # Grid-invariant operands (generous: covers W1^T + bias rows, 2 buffers).
    invariant = 2 * (_round_up(dim_a, 8) * lane_a * 4 + 2 * 8 * lane_a * 4)
    avail = budget - invariant - (4 << 20)              # compiler-scratch headroom
    tm_vmem = max((avail // per_row) // 128 * 128, 128)

    if tm is None:
        tm = 4096                                        # review: 2048-8192 range
    tm = min(tm, tm_vmem)
    if M > 4 * 128:
        # Keep >= ~4 parallel grid steps so both v7x TensorCores get work.
        tm = min(tm, _round_up(_cdiv(M, 4), 128))
    tm = min(tm, _round_up(M, 128))                      # never allocate beyond M
    tm = max(_round_up(tm, 128), 128)                    # lane-dense output slabs
    grid = _cdiv(M, tm)                                  # ragged last block is OK:
    #   rows are independent and the out-of-range tail of the last (1, tm)
    #   output block is never written back, so no input padding copy is needed.

    vmem_limit = int(budget)

    # --- operand layout (no input pad / copy) --------------------------------
    x2d = x_a.reshape(M, dim_a)

    w1_t = jnp.asarray(w1, jnp.float32).T                # x @ w1_t == x @ W1^T
    b1_row = jnp.asarray(b1, jnp.float32).reshape(1, dim_a)
    w2_row = jnp.asarray(w2, jnp.float32).reshape(1, dim_a)
    b2_s = jnp.asarray(b2, jnp.float32).reshape(1)

    common = dict(
        out_shape=jax.ShapeDtypeStruct((1, M), dtype),
        compiler_params=pltpu.CompilerParams(
            dimension_semantics=("parallel",),
            vmem_limit_bytes=vmem_limit,
        ),
    )
    x_spec = pl.BlockSpec((tm, dim_a), lambda i: (i, 0))
    out_spec = pl.BlockSpec((1, tm), lambda i: (0, i))   # lane-dense slabs

    if fuse:
        # One-time weight preprocessing (dim_a^2 work, outside the kernel):
        #   E = x @ (W1^T @ W2^T) + (b1 @ W2^T + b2)
        w_fused = (w1_t @ w2_row.T).reshape(1, dim_a)                  # (1, dim_a) f32
        c_fused = (b1_row @ w2_row.T).reshape(()) + b2_s[0]
        c_fused = c_fused.reshape(1)
        out = pl.pallas_call(
            fused_energy_kernel,
            grid_spec=pltpu.PrefetchScalarGridSpec(
                num_scalar_prefetch=0,
                grid=(grid,),
                in_specs=[
                    x_spec,
                    pl.BlockSpec((1, dim_a), lambda i: (0, 0)),         # w_fused
                    pl.BlockSpec(memory_space=pltpu.MemorySpace.SMEM),  # c
                ],
                out_specs=out_spec,
            ),
            **common,
        )(x2d, w_fused, c_fused)
    else:
        out = pl.pallas_call(
            two_layer_energy_kernel,
            grid_spec=pltpu.PrefetchScalarGridSpec(
                num_scalar_prefetch=0,
                grid=(grid,),
                in_specs=[
                    x_spec,
                    pl.BlockSpec((dim_a, dim_a), lambda i: (0, 0)),     # W1^T
                    pl.BlockSpec((1, dim_a), lambda i: (0, 0)),         # b1
                    pl.BlockSpec((1, dim_a), lambda i: (0, 0)),         # w2
                    pl.BlockSpec(memory_space=pltpu.MemorySpace.SMEM),  # b2
                ],
                out_specs=out_spec,
            ),
            **common,
        )(x2d, w1_t, b1_row, w2_row, b2_s)

    return out[0, :].reshape(batch, nodes)


def init_params(key, dim_a, dtype=jnp.float32):
    """Deterministic synthetic init mimicking nn.Linear shapes."""
    k1, k2, k3, k4 = jax.random.split(key, 4)
    s1 = 1.0 / jnp.sqrt(dim_a)
    w1 = jax.random.uniform(k1, (dim_a, dim_a), dtype, minval=-s1, maxval=s1)
    b1 = jax.random.uniform(k2, (dim_a,), dtype, minval=-s1, maxval=s1)
    w2 = jax.random.uniform(k3, (1, dim_a), dtype, minval=-s1, maxval=s1)
    b2 = jax.random.uniform(k4, (1,), dtype, minval=-s1, maxval=s1)
    return w1, b1, w2, b2


if __name__ == "__main__":
    key = jax.random.PRNGKey(0)
    kx, kp, kx2 = jax.random.split(key, 3)

    dim_a = 32
    w1, b1, w2, b2 = init_params(kp, dim_a)

    def ref_fn(x):
        # Plain JAX reference: same math as the PyTorch XToEnergy forward.
        return ((x @ w1.T + b1) @ w2.T + b2)[..., 0]

    # Case 1: small shape (single 128-row tile, grid = 1, lane-dense output).
    x_small = jax.random.normal(kx, (2, 16, dim_a), jnp.float32)
    e_small = jax.block_until_ready(x_to_energy(x_small, w1, b1, w2, b2))
    assert e_small.shape == (2, 16)
    assert jnp.allclose(e_small, ref_fn(x_small), atol=1e-4, rtol=1e-4)

    # Case 2: multi-step grid with a ragged last block and NO input padding
    # (M = 640 -> tm = 256, grid = 3, last block covers 128 valid rows).
    x_big = jax.random.normal(kx2, (2, 320, dim_a), jnp.float32)
    e_big = jax.block_until_ready(x_to_energy(x_big, w1, b1, w2, b2))
    assert e_big.shape == (2, 320)
    assert jnp.allclose(e_big, ref_fn(x_big), atol=1e-4, rtol=1e-4)

    # Case 3: explicit two-layer (structural) path, same tiling machinery.
    e_big2 = jax.block_until_ready(
        x_to_energy(x_big, w1, b1, w2, b2, fuse=False))
    assert jnp.allclose(e_big2, ref_fn(x_big), atol=1e-4, rtol=1e-4)

    print("KERNEL_OK")
</pallas_src>

<mosaic_0001>
module attributes {stable_mosaic.version = 11 : i64} {
  func.func @fused_energy_kernel(%arg0: i32, %arg1: memref<128x32xf32, #tpu.memory_space<vmem>>, %arg2: memref<1x32xf32, #tpu.memory_space<vmem>>, %arg3: memref<1xf32, #tpu.memory_space<smem>>, %arg4: memref<1x128xf32, #tpu.memory_space<vmem>>) attributes {dimension_semantics = [#tpu.dimension_semantics<parallel>], iteration_bounds = array<i64: 1>, scalar_prefetch = 0 : i64, scratch_operands = 0 : i64, tpu.core_type = #tpu.core_type<tc>, window_params = [{transform_indices = @transform_0, window_bounds = array<i64: 128, 32>}, {pipeline_mode = #tpu.pipeline_mode<synchronous>, transform_indices = @transform_1, window_bounds = array<i64: 1, 32>}, {transform_indices = @transform_2, window_bounds = array<i64: 1>}, {transform_indices = @transform_3, window_bounds = array<i64: 1, 128>}]} {
    %c0 = arith.constant 0 : index
    %c0_0 = arith.constant 0 : index
    %0 = vector.load %arg1[%c0, %c0_0] : memref<128x32xf32, #tpu.memory_space<vmem>>, vector<128x32xf32>
    %c0_1 = arith.constant 0 : index
    %c0_2 = arith.constant 0 : index
    %1 = vector.load %arg2[%c0_1, %c0_2] : memref<1x32xf32, #tpu.memory_space<vmem>>, vector<1x32xf32>
    %2 = vector.broadcast %1 : vector<1x32xf32> to vector<128x32xf32>
    %3 = arith.mulf %0, %2 : vector<128x32xf32>
    %cst = arith.constant dense<0.000000e+00> : vector<128xf32>
    %4 = vector.multi_reduction <add>, %3, %cst [1] : vector<128x32xf32> to vector<128xf32>
    %c0_3 = arith.constant 0 : index
    %5 = memref.load %arg3[%c0_3] : memref<1xf32, #tpu.memory_space<smem>>
    %6 = vector.broadcast %5 : f32 to vector<128xf32>
    %7 = arith.addf %4, %6 : vector<128xf32>
    %8 = vector.shape_cast %7 : vector<128xf32> to vector<1x128xf32>
    %c0_4 = arith.constant 0 : index
    %c0_5 = arith.constant 0 : index
    %9 = vector.load %arg4[%c0_4, %c0_5] : memref<1x128xf32, #tpu.memory_space<vmem>>, vector<1x128xf32>
    tpu.vector_store %arg4[%c0_4, %c0_5], %8 {strides = array<i32>} : memref<1x128xf32, #tpu.memory_space<vmem>>, vector<1x128xf32>,
    return
  }
  func.func @transform_0(%arg0: i32) -> (i32, i32) {
    %c0_i32 = arith.constant 0 : i32
    %c0_i32_0 = arith.constant 0 : i32
    return %arg0, %c0_i32 : i32, i32
  }
  func.func @transform_1(%arg0: i32) -> (i32, i32) {
    %c0_i32 = arith.constant 0 : i32
    %c0_i32_0 = arith.constant 0 : i32
    %c0_i32_1 = arith.constant 0 : i32
    return %c0_i32, %c0_i32_0 : i32, i32
  }
  func.func @transform_2(%arg0: i32) -> i32 {
    %c0_i32 = arith.constant 0 : i32
    %c0_i32_0 = arith.constant 0 : i32
    return %c0_i32 : i32
  }
  func.func @transform_3(%arg0: i32) -> (i32, i32) {
    %c0_i32 = arith.constant 0 : i32
    %c0_i32_0 = arith.constant 0 : i32
    return %c0_i32, %arg0 : i32, i32
  }
}

</mosaic_0001>

<bundles_post_ra>
// kernel: tpu_custom_call.1
= control target key start
LH: loop header
LB: loop body
LE: loop exit
PB: predicated region body
PF: predicated region fallthrough
CT: control target
= control target key end

     0   :  { %9 = vsyncpa [#allocation4], 0  ;;  %s378_s0 = inlined_call_operand.hbm [shape: f32[32,32], index: 0, kind: input, shape index: {}]   ;;  %s379_s1 = inlined_call_operand.vmem [shape: f32[1,32], index: 1, kind: input, shape index: {}]   ;;  %s380_s2 = inlined_call_operand.<no memory space> [shape: f32[1], index: 2, kind: input, shape index: {}]   ;;  %s381_s3 = inlined_call_operand.hbm [shape: f32[1,32], index: 3, kind: output, shape index: {}]  }
   0x1   :  { %10 = vsyncpa [#allocation5], 0 }
   0x2   :  { %14 = vsyncadd [#allocation4], 1536  ;;  %s15_s14 = sshll.u32 %s378_s0, 4  ;;  %s290_s15 = smov [#allocation3]   ;;  %s16_s14 = int_to_ptr.hbm [resolvable:$true] %s15_s14 }
   0x3   :  { %s17_s16 = sshll.u32 %s290_s15, 4  ;;  %s291_s17 = smov 128   ;;  %s18_s16 = int_to_ptr.vmem [resolvable:$true] %s17_s16 }
   0x4   :  { %s292_s18 = smov 8  }
   0x5   :  { %23 = dma.hbm_to_vmem [thread:$0]  %s16_s14, 512, %s18_s16, [#allocation4], %s291_s17, %s291_s17, %s292_s18  }
   0x6   :  { %286 = dma.done.wait [#allocation4], 2048  }
   0x7   :  { %287 = vsyncadd [#allocation4], 4294965248  ;;  %v32_v0 = vld [vmem:[#allocation3] sm:$0xff]  ;;  %vm68_vm0 = vcmask 261120   ;;  %v34_v2 = vld [vmem:[#allocation3 + $0x10] sm:$0xff]  ;;  %v151_v51 = vlaneseq  ;;  %v339_v53 = vstv %s380_s2  ;;  %vm156_vm1 = vcmask 130112  }
   0x8   :  { %v237_v1 = vld [vmem:[%s379_s1] ss:$0 sm:$0xff]  ;;  %v33_v7 = vld [vmem:[#allocation3 + $0x8] sm:$0xff]  ;;  %v35_v8 = vld [vmem:[#allocation3 + $0x18] sm:$0xff]  ;;  %vm160_vm2 = vcmask 195712   ;;  %vm164_vm3 = vcmask 261312  }
   0x9   :  { %v36_v3 = vld [vmem:[#allocation3 + $0x20] sm:$0xff]  ;;  %v52_v4 = vmul.f32 %v237_v1, %v32_v0  ;;  %v54_v5 = vmul.f32 %v237_v1, %v34_v2  ;;  %v37_v12 = vld [vmem:[#allocation3 + $0x28] sm:$0xff]  ;;  %v53_v13 = vmul.f32 %v237_v1, %v33_v7  ;;  %v55_v14 = vmul.f32 %v237_v1, %v35_v8  ;;  %v38_v19 = vld [vmem:[#allocation3 + $0x30] sm:$0xff]  ;;  %s293_s2 = smov [#allocation6]   ;;  %s223_s24 = sshll.u32 %s381_s3, 4  ;;  %s224_s24 = int_to_ptr.hbm [resolvable:$true] %s223_s24 }
   0xa   :  { %v56_v6 = vmul.f32 %v237_v1, %v36_v3  ;;  %v57_v15 = vmul.f32 %v237_v1, %v37_v12  ;;  %v39_v20 = vld [vmem:[#allocation3 + $0x38] sm:$0xff]  ;;  %v40_v21 = vld [vmem:[#allocation3 + $0x40] sm:$0xff]  ;;  %v58_v22 = vmul.f32 %v237_v1, %v38_v19  ;;  %v41_v28 = vld [vmem:[#allocation3 + $0x48] sm:$0xff]  ;;  %v341_v54 = vand.u32 127, %v151_v51  ;;  %s221_s21 = sshll.u32 %s293_s2, 4  ;;  %s222_s21 = int_to_ptr.vmem [resolvable:$true] %s221_s21 }
   0xb   :  { %v69_v9 = vsel %vm68_vm0, %v52_v4, 0.0  ;;  %v75_v10 = vsel %vm68_vm0, %v54_v5, 0.0  ;;  %v72_v16 = vsel %vm68_vm0, %v53_v13, 0.0  ;;  %v78_v17 = vsel %vm68_vm0, %v55_v14, 0.0  ;;  %v42_v29 = vld [vmem:[#allocation3 + $0x50] sm:$0xff]  ;;  %v43_v30 = vld [vmem:[#allocation3 + $0x58] sm:$0xff] }
   0xc   :  { %v81_v11 = vsel %vm68_vm0, %v56_v6, 0.0  ;;  %70 = vadd.xlane.f32.xlu0 %v69_v9  ;;  %76 = vadd.xlane.f32.xlu1 %v75_v10  ;;  %v84_v18 = vsel %vm68_vm0, %v57_v15, 0.0  ;;  %v59_v23 = vmul.f32 %v237_v1, %v39_v20  ;;  %v60_v24 = vmul.f32 %v237_v1, %v40_v21  ;;  %v44_v37 = vld [vmem:[#allocation3 + $0x60] sm:$0xff]  ;;  %v45_v38 = vld [vmem:[#allocation3 + $0x68] sm:$0xff]  ;;  %v46_v39 = vld [vmem:[#allocation3 + $0x70] sm:$0xff] }
   0xd   :  { %82 = vadd.xlane.f32.xlu2 %v81_v11  ;;  %v87_v25 = vsel %vm68_vm0, %v58_v22, 0.0  ;;  %v61_v31 = vmul.f32 %v237_v1, %v41_v28  ;;  %v62_v32 = vmul.f32 %v237_v1, %v42_v29  ;;  %v63_v33 = vmul.f32 %v237_v1, %v43_v30  ;;  %v47_v46 = vld [vmem:[#allocation3 + $0x78] sm:$0xff] }
   0xe   :  { %v90_v26 = vsel %vm68_vm0, %v59_v23, 0.0  ;;  %v93_v27 = vsel %vm68_vm0, %v60_v24, 0.0  ;;  %v64_v40 = vmul.f32 %v237_v1, %v44_v37  ;;  %v65_v41 = vmul.f32 %v237_v1, %v45_v38 }
   0xf   :  { %v96_v34 = vsel %vm68_vm0, %v61_v31, 0.0  ;;  %v99_v35 = vsel %vm68_vm0, %v62_v32, 0.0  ;;  %v102_v36 = vsel %vm68_vm0, %v63_v33, 0.0  ;;  %v66_v42 = vmul.f32 %v237_v1, %v46_v39 }
  0x10   :  { %v105_v43 = vsel %vm68_vm0, %v64_v40, 0.0  ;;  %v108_v44 = vsel %vm68_vm0, %v65_v41, 0.0  ;;  %v67_v47 = vmul.f32 %v237_v1, %v47_v46  ;;  %v154_v56 = vadd.s32 4294967288, %v341_v54 }
  0x11   :  { %v111_v45 = vsel %vm68_vm0, %v66_v42, 0.0  ;;  %v158_v57 = vadd.s32 4294967280, %v341_v54  ;;  %v162_v62 = vadd.s32 4294967272, %v341_v54  ;;  %v166_v6 = vadd.s32 4294967264, %v341_v54 }
  0x12   :  { %v114_v48 = vsel %vm68_vm0, %v67_v47, 0.0  ;;  %v170_v9 = vadd.s32 4294967256, %v341_v54  ;;  %v174_v11 = vadd.s32 4294967248, %v341_v54  ;;  %vm168_vm4 = vcmask 326912  }
  0x13   :  { %v178_v19 = vadd.s32 4294967240, %v341_v54  ;;  %vm172_vm5 = vcmask 392512   ;;  %vm176_vm6 = vcmask 458112   ;;  %v182_v23 = vadd.s32 4294967232, %v341_v54 }
  0x14   :  { %73 = vadd.xlane.f32.xlu0 %v72_v16  ;;  %79 = vadd.xlane.f32.xlu1 %v78_v17  ;;  %vm180_vm7 = vcmask 523712   ;;  %vm184_vm8 = vcmask 589312   ;;  %vm188_vm9 = vcmask 654912   ;;  %v194_v38 = vadd.s32 4294967208, %v341_v54 }
  0x15   :  { %85 = vadd.xlane.f32.xlu2 %v84_v18  ;;  %vm192_vm10 = vcmask 720512   ;;  %vm196_vm11 = vcmask 786112   ;;  %vm200_vm12 = vcmask 851712   ;;  %vm204_vm13 = vcmask 917312  }
  0x16   :  { %vm208_vm14 = vcmask 982912   ;;  %vm212_vm15 = vcmask 1048512  }
  0x1c   :  { %88 = vadd.xlane.f32.xlu0 %v87_v25  ;;  %91 = vadd.xlane.f32.xlu1 %v90_v26 }
  0x1d   :  { %94 = vadd.xlane.f32.xlu2 %v93_v27  ;;  %v186_v27 = vadd.s32 4294967224, %v341_v54 }
  0x24   :  { %97 = vadd.xlane.f32.xlu0 %v96_v34  ;;  %100 = vadd.xlane.f32.xlu1 %v99_v35  ;;  %v190_v34 = vadd.s32 4294967216, %v341_v54 }
  0x25   :  { %103 = vadd.xlane.f32.xlu2 %v102_v36 }
  0x2c   :  { %106 = vadd.xlane.f32.xlu0 %v105_v43  ;;  %109 = vadd.xlane.f32.xlu1 %v108_v44  ;;  %v198_v43 = vadd.s32 4294967200, %v341_v54 }
  0x2d   :  { %112 = vadd.xlane.f32.xlu2 %v111_v45 }
  0x34   :  { %115 = vadd.xlane.f32.xlu0 %v114_v48  ;;  %v202_v48 = vadd.s32 4294967192, %v341_v54 }
  0x7f   :  { %v71_v49 = vpop.xlane.xlu0 %70  ;;  %v77_v50 = vpop.xlane.xlu1 %76 }
  0x80   :  { %v83_v52 = vpop.xlane.xlu2 %82  ;;  %v119_v55 = vadd.f32 %v339_v53, %v71_v49  ;;  %v121_v58 = vadd.f32 %v339_v53, %v77_v50 }
  0x81   :  { %v123_v7 = vadd.f32 %v339_v53, %v83_v52 }
  0x82   :  { %v153_v1 = vperm.slane %v119_v55, %v341_v54  ;;  %v159_v3 = vperm.slane %v121_v58, %v158_v57  ;;  %v206_v55 = vadd.s32 4294967184, %v341_v54 }
  0x83   :  { %v167_v17 = vperm.slane %v123_v7, %v166_v6 }
  0x87   :  { %v74_v59 = vpop.xlane.xlu0 %73  ;;  %v80_v60 = vpop.xlane.xlu1 %79 }
  0x88   :  { %v120_v61 = vadd.f32 %v339_v53, %v74_v59  ;;  %v122_v63 = vadd.f32 %v339_v53, %v80_v60  ;;  %v86_v0 = vpop.xlane.xlu2 %85  ;;  %v210_v60 = vadd.s32 4294967176, %v341_v54 }
  0x89   :  { %v124_v10 = vadd.f32 %v339_v53, %v86_v0 }
  0x8a   :  { %v155_v2 = vperm.slane %v120_v61, %v154_v56  ;;  %v163_v5 = vperm.slane %v122_v63, %v162_v62 }
  0x8b   :  { %v171_v18 = vperm.slane %v124_v10, %v170_v9 }
  0x8c   :  { %v157_v4 = vsel %vm156_vm1, %v155_v2, %v153_v1 }
  0x8d   :  { %v161_v8 = vsel %vm160_vm2, %v159_v3, %v157_v4 }
  0x8e   :  { %v165_v14 = vsel %vm164_vm3, %v163_v5, %v161_v8 }
  0x8f   :  { %v89_v12 = vpop.xlane.xlu0 %88  ;;  %v92_v13 = vpop.xlane.xlu1 %91  ;;  %v169_v21 = vsel %vm168_vm4, %v167_v17, %v165_v14 }
  0x90   :  { %v125_v15 = vadd.f32 %v339_v53, %v89_v12  ;;  %v95_v16 = vpop.xlane.xlu2 %94  ;;  %v126_v20 = vadd.f32 %v339_v53, %v92_v13  ;;  %v173_v25 = vsel %vm172_vm5, %v171_v18, %v169_v21 }
  0x91   :  { %v127_v24 = vadd.f32 %v339_v53, %v95_v16 }
  0x92   :  { %v175_v22 = vperm.slane %v125_v15, %v174_v11  ;;  %v179_v26 = vperm.slane %v126_v20, %v178_v19 }
  0x93   :  { %v183_v33 = vperm.slane %v127_v24, %v182_v23 }
  0x94   :  { %v177_v28 = vsel %vm176_vm6, %v175_v22, %v173_v25 }
  0x95   :  { %v181_v36 = vsel %vm180_vm7, %v179_v26, %v177_v28 }
  0x96   :  { %v185_v40 = vsel %vm184_vm8, %v183_v33, %v181_v36 }
  0x97   :  { %v98_v29 = vpop.xlane.xlu0 %97  ;;  %v101_v30 = vpop.xlane.xlu1 %100 }
  0x98   :  { %v128_v31 = vadd.f32 %v339_v53, %v98_v29  ;;  %v104_v32 = vpop.xlane.xlu2 %103  ;;  %v129_v35 = vadd.f32 %v339_v53, %v101_v30 }
  0x99   :  { %v130_v39 = vadd.f32 %v339_v53, %v104_v32 }
  0x9a   :  { %v187_v37 = vperm.slane %v128_v31, %v186_v27  ;;  %v191_v41 = vperm.slane %v129_v35, %v190_v34 }
  0x9b   :  { %v195_v46 = vperm.slane %v130_v39, %v194_v38 }
  0x9c   :  { %v189_v42 = vsel %vm188_vm9, %v187_v37, %v185_v40 }
  0x9d   :  { %v193_v51 = vsel %vm192_vm10, %v191_v41, %v189_v42 }
  0x9e   :  { %v197_v57 = vsel %vm196_vm11, %v195_v46, %v193_v51 }
  0x9f   :  { %v107_v44 = vpop.xlane.xlu0 %106  ;;  %v110_v45 = vpop.xlane.xlu1 %109 }
  0xa0   :  { %v131_v47 = vadd.f32 %v339_v53, %v107_v44  ;;  %v132_v49 = vadd.f32 %v339_v53, %v110_v45  ;;  %v113_v50 = vpop.xlane.xlu2 %112 }
  0xa1   :  { %v133_v56 = vadd.f32 %v339_v53, %v113_v50 }
  0xa2   :  { %v199_v52 = vperm.slane %v131_v47, %v198_v43  ;;  %v203_v58 = vperm.slane %v132_v49, %v202_v48 }
  0xa3   :  { %v207_v61 = vperm.slane %v133_v56, %v206_v55 }
  0xa4   :  { %v201_v59 = vsel %vm200_vm12, %v199_v52, %v197_v57 }
  0xa5   :  { %v205_v63 = vsel %vm204_vm13, %v203_v58, %v201_v59 }
  0xa6   :  { %v209_v2 = vsel %vm208_vm14, %v207_v61, %v205_v63 }
  0xa7   :  { %v116_v62 = vpop.xlane.xlu0 %115 }
  0xa8   :  { %v134_v0 = vadd.f32 %v339_v53, %v116_v62 }
  0xaa   :  { %v211_v1 = vperm.slane %v134_v0, %v210_v60 }
  0xac   :  { %v213_v3 = vsel %vm212_vm15, %v211_v1, %v209_v2 }
  0xad   :  { %215 = vst [vmem:[#allocation6] sm:$0x1] %v213_v3 }
  0xae   :  { %226 = dma.vmem_to_hbm [thread:$0]  %s222_s21, 16, %s224_s24, [#allocation5]  }
  0xaf   :  { %288 = dma.done.wait [#allocation5], 16  }
  0xb0   :  { %289 = vsyncadd [#allocation5], 4294967280 }
  0xb1   :  { %231 = vsyncpa [#allocation4], 1 }
  0xb2   :  { %232 = vsyncpa [#allocation5], 1 }

</bundles_post_ra>
